<compile_context>
chip_gen: v6e
topology: v6e:2x2x1
jax: 0.10.0
libtpu: 0.0.40
codegen_flags: <defaults>
</compile_context>

<pallas_src>
import math
import numpy as np
import jax
import jax.numpy as jnp
from jax import lax
from jax.experimental import pallas as pl
from jax.experimental.pallas import tpu as pltpu

# ----------------------------- config (small synthetic shapes) ---------------
VOCAB = 50
HIDDEN = 32
SELECT_GENE_NUM = 7          # seq length = select_gene_num + 1
SEQ = SELECT_GENE_NUM + 1    # 8
GENE_NUM = 16
BATCH = 2
LN_EPS = 1e-12

# Packed-weight layout (all section offsets are multiples of 8 sublanes).
VPAD = 56                               # vocab 50 padded to 56 rows
OFF_EMB = 0                             # rows   0: 56  embedding table
OFF_WCLS = OFF_EMB + VPAD               # rows  56: 72  is_exp_cls weight (G,H)
OFF_WFFN = OFF_WCLS + GENE_NUM          # rows  72: 88  exp_ffn    weight (G,H)
OFF_FC2A = OFF_WFFN + GENE_NUM          # rows  88:120  exp_fc2 weight rows [:H]
OFF_FC2B = OFF_FC2A + HIDDEN            # rows 120:152  exp_fc2 weight rows [H:]
OFF_VEC = OFF_FC2B + HIDDEN             # rows 152:160  7 bias/scale vectors + pad
PACK_ROWS = OFF_VEC + 8                 # 160 rows total  (160*32*4 B = 20 KB)


# --------------------- the single fused kernel -------------------------------
def _fused_kernel(glens_ref,                              # SMEM scalar prefetch (B,)
                  idx_ref, exp_ref, goh_ref, aexp_ref,    # activations
                  pos_ref, w_ref,                         # pos table + packed weights
                  o_ref):                                 # output (R, H), R = B*S
    R, H = o_ref.shape
    B, G = goh_ref.shape
    S = R // B

    # ---- unpack weights (static, sublane-aligned slices of the packed block) -
    emb = w_ref[OFF_EMB:OFF_EMB + VPAD, :]                 # (VPAD, H)
    wcls = w_ref[OFF_WCLS:OFF_WCLS + G, :]                 # (G, H)
    wffn = w_ref[OFF_WFFN:OFF_WFFN + G, :]                 # (G, H)
    wfc2a = w_ref[OFF_FC2A:OFF_FC2A + H, :]                # (H, H)
    wfc2b = w_ref[OFF_FC2B:OFF_FC2B + H, :]                # (H, H)
    vecs = w_ref[OFF_VEC:OFF_VEC + 8, :]                   # (8, H)
    b_cls = vecs[0:1, :]
    b_ffn = vecs[1:2, :]
    w_exp = vecs[2:3, :]
    b_exp = vecs[3:4, :]
    b_fc2 = vecs[4:5, :]
    gamma = vecs[5:6, :]
    beta = vecs[6:7, :]

    # ---- gene_embeddings lookup: one-hot (R,VPAD) @ (VPAD,H) on the MXU ------
    idx = idx_ref[...]                                               # (R, 1) int32
    iota_v = lax.broadcasted_iota(jnp.int32, (R, VPAD), 1)
    one_hot = (idx == iota_v).astype(jnp.float32)                    # (R, VPAD)
    g = jnp.dot(one_hot, emb, preferred_element_type=jnp.float32)    # (R, H)

    # ---- exp_emb = Linear(1 -> H)(exp) ---------------------------------------
    e = exp_ref[...] * w_exp + b_exp                                 # (R,1)*(1,H)+(1,H)

    # ---- is_exp_cls / exp_ffn projections (B,G) @ (G,H) ----------------------
    exp_cls = jnp.dot(goh_ref[...], wcls,
                      preferred_element_type=jnp.float32) + b_cls    # (B, H)
    exp_all = jnp.dot(aexp_ref[...], wffn,
                      preferred_element_type=jnp.float32) + b_ffn    # (B, H)

    # ---- per-batch row replacement at flat row b*S + g_lens[b] ---------------
    r_col = lax.broadcasted_iota(jnp.int32, (R, 1), 0)               # flat row index
    for b in range(B):                                               # static, tiny B
        l = glens_ref[b]                                             # SMEM scalar
        m = jnp.logical_and(r_col == b * S + l, l < S)               # (R, 1) bool
        g = jnp.where(m, exp_cls[b:b + 1, :], g)
        e = jnp.where(m, exp_all[b:b + 1, :], e)

    # ---- add positional encoding (pos table pre-tiled to (R, H)) -------------
    g = g + pos_ref[...]

    # ---- exp_fc2 on concat(g, e) == g @ W[:H] + e @ W[H:] + b -----------------
    fus = (jnp.dot(g, wfc2a, preferred_element_type=jnp.float32)
           + jnp.dot(e, wfc2b, preferred_element_type=jnp.float32)
           + b_fc2)                                                  # (R, H)

    # ---- LayerNorm over hidden ------------------------------------------------
    mean = jnp.mean(fus, axis=-1, keepdims=True)
    var = jnp.mean((fus - mean) ** 2, axis=-1, keepdims=True)
    out = (fus - mean) * lax.rsqrt(var + LN_EPS) * gamma + beta

    o_ref[...] = out.astype(o_ref.dtype)


def gene_embeddings_fused_call(g_lens, idx2, exp2, gene_onehot, all_exp_arr,
                               pos_r, w_packed):
    R = idx2.shape[0]
    H = HIDDEN
    B, G = gene_onehot.shape
    zz = lambda i, gl: (0, 0)   # every operand is a single full-array VMEM block

    grid_spec = pltpu.PrefetchScalarGridSpec(
        num_scalar_prefetch=1,            # g_lens -> SMEM
        grid=(1,),
        in_specs=[
            pl.BlockSpec((R, 1), zz),             # gene_idx column (int32)
            pl.BlockSpec((R, 1), zz),             # exp column
            pl.BlockSpec((B, G), zz),             # gene_onehot
            pl.BlockSpec((B, G), zz),             # all_exp_arr
            pl.BlockSpec((R, H), zz),             # positional-encoding table (tiled)
            pl.BlockSpec((PACK_ROWS, H), zz),     # packed weights / biases
        ],
        out_specs=pl.BlockSpec((R, H), zz),
    )
    return pl.pallas_call(
        _fused_kernel,
        out_shape=jax.ShapeDtypeStruct((R, H), jnp.float32),
        grid_spec=grid_spec,
        compiler_params=pltpu.CompilerParams(dimension_semantics=("arbitrary",)),
    )(g_lens, idx2, exp2, gene_onehot, all_exp_arr, pos_r, w_packed)


# ----------------------------- glue / parameter setup ------------------------
def sinusoidal_pos_encoding(max_len, d_model):
    position = np.arange(max_len, dtype=np.float32)[:, None]
    div_term = np.exp(np.arange(0, d_model, 2, dtype=np.float32)
                      * (-math.log(10000.0) / d_model))
    pe = np.zeros((max_len, d_model), dtype=np.float32)
    pe[:, 0::2] = np.sin(position * div_term)
    pe[:, 1::2] = np.cos(position * div_term)
    return jnp.asarray(pe)


def init_params(key):
    ks = jax.random.split(key, 10)
    s = 0.05
    return {
        "emb":   jax.random.normal(ks[0], (VOCAB, HIDDEN), jnp.float32) * s,
        "w_cls": jax.random.normal(ks[1], (GENE_NUM, HIDDEN), jnp.float32) * s,
        "b_cls": jax.random.normal(ks[2], (1, HIDDEN), jnp.float32) * s,
        "w_ffn": jax.random.normal(ks[3], (GENE_NUM, HIDDEN), jnp.float32) * s,
        "b_ffn": jax.random.normal(ks[4], (1, HIDDEN), jnp.float32) * s,
        "w_exp": jax.random.normal(ks[5], (1, HIDDEN), jnp.float32) * s,
        "b_exp": jax.random.normal(ks[6], (1, HIDDEN), jnp.float32) * s,
        "w_fc2": jax.random.normal(ks[7], (2 * HIDDEN, HIDDEN), jnp.float32) * s,
        "b_fc2": jax.random.normal(ks[8], (1, HIDDEN), jnp.float32) * s,
        "gamma": jnp.ones((1, HIDDEN), jnp.float32),
        "beta":  jnp.zeros((1, HIDDEN), jnp.float32),
    }


def pack_params(params):
    """Pack every weight/bias into one (PACK_ROWS, H) block (done once)."""
    emb_pad = jnp.zeros((VPAD, HIDDEN), jnp.float32).at[:VOCAB].set(params["emb"])
    vecs = jnp.concatenate(
        [params["b_cls"], params["b_ffn"], params["w_exp"], params["b_exp"],
         params["b_fc2"], params["gamma"], params["beta"],
         jnp.zeros((1, HIDDEN), jnp.float32)], axis=0)                    # (8, H)
    packed = jnp.concatenate(
        [emb_pad, params["w_cls"], params["w_ffn"],
         params["w_fc2"][:HIDDEN], params["w_fc2"][HIDDEN:], vecs], axis=0)
    assert packed.shape == (PACK_ROWS, HIDDEN)
    return packed


@jax.jit
def gene_embeddings_forward(w_packed, pos, gene_idx, exp, gene_onehot,
                            all_exp_arr, g_lens):
    B, S = gene_idx.shape
    R = B * S
    # Cheap layout prep only (fused by XLA into parameter feeds):
    idx2 = gene_idx.reshape(R, 1).astype(jnp.int32)
    exp2 = exp.reshape(R, 1).astype(jnp.float32)
    pos_r = jnp.tile(pos, (B, 1))                 # (R, H) positional table
    out2d = gene_embeddings_fused_call(
        g_lens.astype(jnp.int32), idx2, exp2, gene_onehot, all_exp_arr,
        pos_r, w_packed)
    return out2d.reshape(B, S, HIDDEN)


# ----------------------------- pure-JAX reference ----------------------------
def reference(params, pos, gene_idx, exp, gene_onehot, all_exp_arr, g_lens):
    exp_cls = gene_onehot @ params["w_cls"] + params["b_cls"]              # (B, H)
    exp_all = all_exp_arr @ params["w_ffn"] + params["b_ffn"]              # (B, H)
    g_emb = params["emb"][gene_idx]                                        # (B, S, H)
    exp_emb = exp[..., None] * params["w_exp"] + params["b_exp"]           # (B, S, H)
    mask = (jnp.arange(SEQ)[None, :] == g_lens[:, None])[..., None]
    g_emb = jnp.where(mask, exp_cls[:, None, :], g_emb)
    exp_emb = jnp.where(mask, exp_all[:, None, :], exp_emb)
    g_emb = g_emb + pos[None]
    fus = jnp.concatenate([g_emb, exp_emb], axis=-1) @ params["w_fc2"] + params["b_fc2"]
    mean = fus.mean(-1, keepdims=True)
    var = ((fus - mean) ** 2).mean(-1, keepdims=True)
    return (fus - mean) / jnp.sqrt(var + LN_EPS) * params["gamma"] + params["beta"]


# ----------------------------- main -------------------------------------------
if __name__ == "__main__":
    key = jax.random.PRNGKey(0)
    k_p, k_idx, k_exp, k_oh, k_all, k_len = jax.random.split(key, 6)

    params = init_params(k_p)
    w_packed = pack_params(params)                # packed once, reused every step
    pos = sinusoidal_pos_encoding(SEQ, HIDDEN)

    gene_idx = jax.random.randint(k_idx, (BATCH, SEQ), 0, VOCAB)
    exp = jax.random.normal(k_exp, (BATCH, SEQ), jnp.float32)
    gene_onehot = jax.random.normal(k_oh, (BATCH, GENE_NUM), jnp.float32)
    all_exp_arr = jax.random.normal(k_all, (BATCH, GENE_NUM), jnp.float32)
    g_lens = jax.random.randint(k_len, (BATCH,), 1, SEQ)

    out = gene_embeddings_forward(w_packed, pos, gene_idx, exp, gene_onehot,
                                  all_exp_arr, g_lens)
    out = jax.block_until_ready(out)

    ref = reference(params, pos, gene_idx, exp, gene_onehot, all_exp_arr, g_lens)
    assert out.shape == (BATCH, SEQ, HIDDEN)
    assert jnp.allclose(out, ref, atol=1e-3, rtol=1e-3), "mismatch vs reference"

    print("KERNEL_OK")
</pallas_src>

<mosaic_0001>
module attributes {stable_mosaic.version = 11 : i64} {
  func.func @_fused_kernel(%arg0: i32, %arg1: memref<2xi32, #tpu.memory_space<smem>>, %arg2: memref<16x1xi32, #tpu.memory_space<vmem>>, %arg3: memref<16x1xf32, #tpu.memory_space<vmem>>, %arg4: memref<2x16xf32, #tpu.memory_space<vmem>>, %arg5: memref<2x16xf32, #tpu.memory_space<vmem>>, %arg6: memref<16x32xf32, #tpu.memory_space<vmem>>, %arg7: memref<160x32xf32, #tpu.memory_space<vmem>>, %arg8: memref<16x32xf32, #tpu.memory_space<vmem>>) attributes {dimension_semantics = [#tpu.dimension_semantics<arbitrary>], iteration_bounds = array<i64: 1>, scalar_prefetch = 1 : i64, scratch_operands = 0 : i64, tpu.core_type = #tpu.core_type<tc>, window_params = [{pipeline_mode = #tpu.pipeline_mode<synchronous>, transform_indices = @transform_0, window_bounds = array<i64: 16, 1>}, {pipeline_mode = #tpu.pipeline_mode<synchronous>, transform_indices = @transform_1, window_bounds = array<i64: 16, 1>}, {pipeline_mode = #tpu.pipeline_mode<synchronous>, transform_indices = @transform_2, window_bounds = array<i64: 2, 16>}, {pipeline_mode = #tpu.pipeline_mode<synchronous>, transform_indices = @transform_3, window_bounds = array<i64: 2, 16>}, {pipeline_mode = #tpu.pipeline_mode<synchronous>, transform_indices = @transform_4, window_bounds = array<i64: 16, 32>}, {pipeline_mode = #tpu.pipeline_mode<synchronous>, transform_indices = @transform_5, window_bounds = array<i64: 160, 32>}, {pipeline_mode = #tpu.pipeline_mode<synchronous>, transform_indices = @transform_6, window_bounds = array<i64: 16, 32>}]} {
    %c0 = arith.constant 0 : index
    %c0_0 = arith.constant 0 : index
    %0 = vector.load %arg7[%c0, %c0_0] : memref<160x32xf32, #tpu.memory_space<vmem>>, vector<56x32xf32>
    %c56 = arith.constant 56 : index
    %c0_1 = arith.constant 0 : index
    %1 = vector.load %arg7[%c56, %c0_1] : memref<160x32xf32, #tpu.memory_space<vmem>>, vector<16x32xf32>
    %c72 = arith.constant 72 : index
    %c0_2 = arith.constant 0 : index
    %2 = vector.load %arg7[%c72, %c0_2] : memref<160x32xf32, #tpu.memory_space<vmem>>, vector<16x32xf32>
    %c88 = arith.constant 88 : index
    %c0_3 = arith.constant 0 : index
    %3 = vector.load %arg7[%c88, %c0_3] : memref<160x32xf32, #tpu.memory_space<vmem>>, vector<32x32xf32>
    %c120 = arith.constant 120 : index
    %c0_4 = arith.constant 0 : index
    %4 = vector.load %arg7[%c120, %c0_4] : memref<160x32xf32, #tpu.memory_space<vmem>>, vector<32x32xf32>
    %c152 = arith.constant 152 : index
    %c0_5 = arith.constant 0 : index
    %5 = vector.load %arg7[%c152, %c0_5] : memref<160x32xf32, #tpu.memory_space<vmem>>, vector<8x32xf32>
    %6 = vector.extract_strided_slice %5 {offsets = [0, 0], sizes = [1, 32], strides = [1, 1]} : vector<8x32xf32> to vector<1x32xf32>
    %7 = vector.extract_strided_slice %5 {offsets = [1, 0], sizes = [1, 32], strides = [1, 1]} : vector<8x32xf32> to vector<1x32xf32>
    %8 = vector.extract_strided_slice %5 {offsets = [2, 0], sizes = [1, 32], strides = [1, 1]} : vector<8x32xf32> to vector<1x32xf32>
    %9 = vector.extract_strided_slice %5 {offsets = [3, 0], sizes = [1, 32], strides = [1, 1]} : vector<8x32xf32> to vector<1x32xf32>
    %10 = vector.extract_strided_slice %5 {offsets = [4, 0], sizes = [1, 32], strides = [1, 1]} : vector<8x32xf32> to vector<1x32xf32>
    %11 = vector.extract_strided_slice %5 {offsets = [5, 0], sizes = [1, 32], strides = [1, 1]} : vector<8x32xf32> to vector<1x32xf32>
    %12 = vector.extract_strided_slice %5 {offsets = [6, 0], sizes = [1, 32], strides = [1, 1]} : vector<8x32xf32> to vector<1x32xf32>
    %c0_6 = arith.constant 0 : index
    %c0_7 = arith.constant 0 : index
    %13 = vector.load %arg2[%c0_6, %c0_7] : memref<16x1xi32, #tpu.memory_space<vmem>>, vector<16x1xi32>
    %14 = tpu.iota {dimensions = array<i32: 1>} : vector<16x56xi32>
    %15 = vector.broadcast %13 : vector<16x1xi32> to vector<16x56xi32>
    %16 = arith.cmpi eq, %15, %14 : vector<16x56xi32>
    %17 = arith.extui %16 : vector<16x56xi1> to vector<16x56xi32>
    %18 = arith.sitofp %17 : vector<16x56xi32> to vector<16x56xf32>
    %cst = arith.constant dense<0.000000e+00> : vector<16x32xf32>
    %19 = tpu.matmul %18, %0, %cst {dimension_numbers = #tpu.dot_dimension_numbers<[1], [0], [0], [1], [0, 0, 1, 1], [], []>} : vector<16x56xf32>, vector<56x32xf32>, vector<16x32xf32> -> vector<16x32xf32>
    %c0_8 = arith.constant 0 : index
    %c0_9 = arith.constant 0 : index
    %20 = vector.load %arg3[%c0_8, %c0_9] : memref<16x1xf32, #tpu.memory_space<vmem>>, vector<16x1xf32>
    %21 = vector.broadcast %20 : vector<16x1xf32> to vector<16x32xf32>
    %22 = vector.broadcast %8 : vector<1x32xf32> to vector<16x32xf32>
    %23 = arith.mulf %21, %22 : vector<16x32xf32>
    %24 = vector.broadcast %9 : vector<1x32xf32> to vector<16x32xf32>
    %25 = arith.addf %23, %24 : vector<16x32xf32>
    %c0_10 = arith.constant 0 : index
    %c0_11 = arith.constant 0 : index
    %26 = vector.load %arg4[%c0_10, %c0_11] : memref<2x16xf32, #tpu.memory_space<vmem>>, vector<2x16xf32>
    %cst_12 = arith.constant dense<0.000000e+00> : vector<2x32xf32>
    %27 = tpu.matmul %26, %1, %cst_12 {dimension_numbers = #tpu.dot_dimension_numbers<[1], [0], [0], [1], [0, 0, 1, 1], [], []>} : vector<2x16xf32>, vector<16x32xf32>, vector<2x32xf32> -> vector<2x32xf32>
    %28 = vector.broadcast %6 : vector<1x32xf32> to vector<2x32xf32>
    %29 = arith.addf %27, %28 : vector<2x32xf32>
    %c0_13 = arith.constant 0 : index
    %c0_14 = arith.constant 0 : index
    %30 = vector.load %arg5[%c0_13, %c0_14] : memref<2x16xf32, #tpu.memory_space<vmem>>, vector<2x16xf32>
    %cst_15 = arith.constant dense<0.000000e+00> : vector<2x32xf32>
    %31 = tpu.matmul %30, %2, %cst_15 {dimension_numbers = #tpu.dot_dimension_numbers<[1], [0], [0], [1], [0, 0, 1, 1], [], []>} : vector<2x16xf32>, vector<16x32xf32>, vector<2x32xf32> -> vector<2x32xf32>
    %32 = vector.broadcast %7 : vector<1x32xf32> to vector<2x32xf32>
    %33 = arith.addf %31, %32 : vector<2x32xf32>
    %34 = tpu.iota {dimensions = array<i32: 0>} : vector<16x1xi32>
    %c0_16 = arith.constant 0 : index
    %35 = memref.load %arg1[%c0_16] : memref<2xi32, #tpu.memory_space<smem>>
    %c0_i32 = arith.constant 0 : i32
    %36 = arith.addi %c0_i32, %35 : i32
    %37 = vector.broadcast %36 : i32 to vector<16x1xi32>
    %38 = arith.cmpi eq, %34, %37 : vector<16x1xi32>
    %c8_i32 = arith.constant 8 : i32
    %39 = arith.cmpi slt, %35, %c8_i32 : i32
    %40 = vector.broadcast %39 : i1 to vector<16x1xi1>
    %41 = arith.andi %38, %40 : vector<16x1xi1>
    %42 = vector.extract_strided_slice %29 {offsets = [0, 0], sizes = [1, 32], strides = [1, 1]} : vector<2x32xf32> to vector<1x32xf32>
    %43 = vector.shape_cast %41 : vector<16x1xi1> to vector<16x1xi1>
    %44 = vector.broadcast %43 : vector<16x1xi1> to vector<16x32xi1>
    %45 = vector.shape_cast %42 : vector<1x32xf32> to vector<1x32xf32>
    %46 = vector.broadcast %45 : vector<1x32xf32> to vector<16x32xf32>
    %47 = arith.select %44, %46, %19 : vector<16x32xi1>, vector<16x32xf32>
    %48 = vector.extract_strided_slice %33 {offsets = [0, 0], sizes = [1, 32], strides = [1, 1]} : vector<2x32xf32> to vector<1x32xf32>
    %49 = vector.shape_cast %41 : vector<16x1xi1> to vector<16x1xi1>
    %50 = vector.broadcast %49 : vector<16x1xi1> to vector<16x32xi1>
    %51 = vector.shape_cast %48 : vector<1x32xf32> to vector<1x32xf32>
    %52 = vector.broadcast %51 : vector<1x32xf32> to vector<16x32xf32>
    %53 = arith.select %50, %52, %25 : vector<16x32xi1>, vector<16x32xf32>
    %c1 = arith.constant 1 : index
    %54 = memref.load %arg1[%c1] : memref<2xi32, #tpu.memory_space<smem>>
    %c8_i32_17 = arith.constant 8 : i32
    %55 = arith.addi %c8_i32_17, %54 : i32
    %56 = vector.broadcast %55 : i32 to vector<16x1xi32>
    %57 = arith.cmpi eq, %34, %56 : vector<16x1xi32>
    %c8_i32_18 = arith.constant 8 : i32
    %58 = arith.cmpi slt, %54, %c8_i32_18 : i32
    %59 = vector.broadcast %58 : i1 to vector<16x1xi1>
    %60 = arith.andi %57, %59 : vector<16x1xi1>
    %61 = vector.extract_strided_slice %29 {offsets = [1, 0], sizes = [1, 32], strides = [1, 1]} : vector<2x32xf32> to vector<1x32xf32>
    %62 = vector.shape_cast %60 : vector<16x1xi1> to vector<16x1xi1>
    %63 = vector.broadcast %62 : vector<16x1xi1> to vector<16x32xi1>
    %64 = vector.shape_cast %61 : vector<1x32xf32> to vector<1x32xf32>
    %65 = vector.broadcast %64 : vector<1x32xf32> to vector<16x32xf32>
    %66 = arith.select %63, %65, %47 : vector<16x32xi1>, vector<16x32xf32>
    %67 = vector.extract_strided_slice %33 {offsets = [1, 0], sizes = [1, 32], strides = [1, 1]} : vector<2x32xf32> to vector<1x32xf32>
    %68 = vector.shape_cast %60 : vector<16x1xi1> to vector<16x1xi1>
    %69 = vector.broadcast %68 : vector<16x1xi1> to vector<16x32xi1>
    %70 = vector.shape_cast %67 : vector<1x32xf32> to vector<1x32xf32>
    %71 = vector.broadcast %70 : vector<1x32xf32> to vector<16x32xf32>
    %72 = arith.select %69, %71, %53 : vector<16x32xi1>, vector<16x32xf32>
    %c0_19 = arith.constant 0 : index
    %c0_20 = arith.constant 0 : index
    %73 = vector.load %arg6[%c0_19, %c0_20] : memref<16x32xf32, #tpu.memory_space<vmem>>, vector<16x32xf32>
    %74 = arith.addf %66, %73 : vector<16x32xf32>
    %cst_21 = arith.constant dense<0.000000e+00> : vector<16x32xf32>
    %75 = tpu.matmul %74, %3, %cst_21 {dimension_numbers = #tpu.dot_dimension_numbers<[1], [0], [0], [1], [0, 0, 1, 1], [], []>} : vector<16x32xf32>, vector<32x32xf32>, vector<16x32xf32> -> vector<16x32xf32>
    %cst_22 = arith.constant dense<0.000000e+00> : vector<16x32xf32>
    %76 = tpu.matmul %72, %4, %cst_22 {dimension_numbers = #tpu.dot_dimension_numbers<[1], [0], [0], [1], [0, 0, 1, 1], [], []>} : vector<16x32xf32>, vector<32x32xf32>, vector<16x32xf32> -> vector<16x32xf32>
    %77 = arith.addf %75, %76 : vector<16x32xf32>
    %78 = vector.broadcast %10 : vector<1x32xf32> to vector<16x32xf32>
    %79 = arith.addf %77, %78 : vector<16x32xf32>
    %cst_23 = arith.constant dense<0.000000e+00> : vector<16xf32>
    %80 = vector.multi_reduction <add>, %79, %cst_23 [1] : vector<16x32xf32> to vector<16xf32>
    %81 = vector.shape_cast %80 : vector<16xf32> to vector<16x1xf32>
    %cst_24 = arith.constant 3.200000e+01 : f32
    %82 = vector.broadcast %cst_24 : f32 to vector<16x1xf32>
    %83 = arith.divf %81, %82 : vector<16x1xf32>
    %84 = vector.broadcast %83 : vector<16x1xf32> to vector<16x32xf32>
    %85 = arith.subf %79, %84 : vector<16x32xf32>
    %86 = arith.mulf %85, %85 : vector<16x32xf32>
    %cst_25 = arith.constant dense<0.000000e+00> : vector<16xf32>
    %87 = vector.multi_reduction <add>, %86, %cst_25 [1] : vector<16x32xf32> to vector<16xf32>
    %88 = vector.shape_cast %87 : vector<16xf32> to vector<16x1xf32>
    %cst_26 = arith.constant 3.200000e+01 : f32
    %89 = vector.broadcast %cst_26 : f32 to vector<16x1xf32>
    %90 = arith.divf %88, %89 : vector<16x1xf32>
    %91 = vector.broadcast %83 : vector<16x1xf32> to vector<16x32xf32>
    %92 = arith.subf %79, %91 : vector<16x32xf32>
    %cst_27 = arith.constant 9.99999996E-13 : f32
    %93 = vector.broadcast %cst_27 : f32 to vector<16x1xf32>
    %94 = arith.addf %90, %93 : vector<16x1xf32>
    %95 = math.rsqrt %94 : vector<16x1xf32>
    %96 = vector.broadcast %95 : vector<16x1xf32> to vector<16x32xf32>
    %97 = arith.mulf %92, %96 : vector<16x32xf32>
    %98 = vector.broadcast %11 : vector<1x32xf32> to vector<16x32xf32>
    %99 = arith.mulf %97, %98 : vector<16x32xf32>
    %100 = vector.broadcast %12 : vector<1x32xf32> to vector<16x32xf32>
    %101 = arith.addf %99, %100 : vector<16x32xf32>
    %c0_28 = arith.constant 0 : index
    %c0_29 = arith.constant 0 : index
    %102 = vector.load %arg8[%c0_28, %c0_29] : memref<16x32xf32, #tpu.memory_space<vmem>>, vector<16x32xf32>
    tpu.vector_store %arg8[%c0_28, %c0_29], %101 {strides = array<i32>} : memref<16x32xf32, #tpu.memory_space<vmem>>, vector<16x32xf32>,
    return
  }
  func.func @transform_0(%arg0: i32, %arg1: memref<2xi32, #tpu.memory_space<smem>>) -> (i32, i32) {
    %c0_i32 = arith.constant 0 : i32
    %c0_i32_0 = arith.constant 0 : i32
    %c0_i32_1 = arith.constant 0 : i32
    return %c0_i32, %c0_i32_0 : i32, i32
  }
  func.func @transform_1(%arg0: i32, %arg1: memref<2xi32, #tpu.memory_space<smem>>) -> (i32, i32) {
    %c0_i32 = arith.constant 0 : i32
    %c0_i32_0 = arith.constant 0 : i32
    %c0_i32_1 = arith.constant 0 : i32
    return %c0_i32, %c0_i32_0 : i32, i32
  }
  func.func @transform_2(%arg0: i32, %arg1: memref<2xi32, #tpu.memory_space<smem>>) -> (i32, i32) {
    %c0_i32 = arith.constant 0 : i32
    %c0_i32_0 = arith.constant 0 : i32
    %c0_i32_1 = arith.constant 0 : i32
    return %c0_i32, %c0_i32_0 : i32, i32
  }
  func.func @transform_3(%arg0: i32, %arg1: memref<2xi32, #tpu.memory_space<smem>>) -> (i32, i32) {
    %c0_i32 = arith.constant 0 : i32
    %c0_i32_0 = arith.constant 0 : i32
    %c0_i32_1 = arith.constant 0 : i32
    return %c0_i32, %c0_i32_0 : i32, i32
  }
  func.func @transform_4(%arg0: i32, %arg1: memref<2xi32, #tpu.memory_space<smem>>) -> (i32, i32) {
    %c0_i32 = arith.constant 0 : i32
    %c0_i32_0 = arith.constant 0 : i32
    %c0_i32_1 = arith.constant 0 : i32
    return %c0_i32, %c0_i32_0 : i32, i32
  }
  func.func @transform_5(%arg0: i32, %arg1: memref<2xi32, #tpu.memory_space<smem>>) -> (i32, i32) {
    %c0_i32 = arith.constant 0 : i32
    %c0_i32_0 = arith.constant 0 : i32
    %c0_i32_1 = arith.constant 0 : i32
    return %c0_i32, %c0_i32_0 : i32, i32
  }
  func.func @transform_6(%arg0: i32, %arg1: memref<2xi32, #tpu.memory_space<smem>>) -> (i32, i32) {
    %c0_i32 = arith.constant 0 : i32
    %c0_i32_0 = arith.constant 0 : i32
    %c0_i32_1 = arith.constant 0 : i32
    return %c0_i32, %c0_i32_0 : i32, i32
  }
}

</mosaic_0001>

<bundles_post_ra>
// kernel: gene_embeddings_forward.1
= control target key start
LH: loop header
LB: loop body
LE: loop exit
PB: predicated region body
PF: predicated region fallthrough
CT: control target
= control target key end

     0   :  { %s1003_s0 = inlined_call_operand.vmem [shape: s32[2], index: 0, kind: input, shape index: {}]   ;;  %s1004_s1 = inlined_call_operand.vmem [shape: s32[16,1], index: 1, kind: input, shape index: {}]   ;;  %s1005_s2 = inlined_call_operand.vmem [shape: f32[16,1], index: 2, kind: input, shape index: {}]   ;;  %s1006_s3 = inlined_call_operand.vmem [shape: f32[2,16], index: 3, kind: input, shape index: {}]   ;;  %s1007_s4 = inlined_call_operand.vmem [shape: f32[2,16], index: 4, kind: input, shape index: {}]   ;;  %s1008_s5 = inlined_call_operand.vmem [shape: f32[16,32], index: 5, kind: input, shape index: {}]   ;;  %s1009_s6 = inlined_call_operand.vmem [shape: f32[160,32], index: 6, kind: input, shape index: {}]   ;;  %s1010_s7 = inlined_call_operand.hbm [shape: f32[16,32], index: 7, kind: output, shape index: {}]  }
   0x1   :  { %s12_s26 = sshll.u32 %s1003_s0, 4  ;;  %s13_s26 = int_to_ptr.vmem [resolvable:$true] %s12_s26 }
   0x2   :  { %s720_s27 = scalar_lea.vmem %s13_s26, 16  ;;  %p725_p1 = scmp.lt.s32.totalorder %s13_s26, %s13_s26 }
   0x3   :  { %p721_p0 = scmp.ne.s32.totalorder %s13_s26, %s720_s27  ;;  %p726_p2 = scmp.lt.s32.totalorder %s720_s27, %s720_s27 }
   0x5   :  { %p727_p3 = por %p726_p2, %p725_p1 }
   0x7   :  { %p728_p4 = pnand %p727_p3, %p721_p0 }
   0x9   :  { %731 = shalt.err (!%p728_p4)  }
   0xa   :  { %s756_s28 = smov [#allocation3]  }
   0xb   :  { %15 = dma.vmem_to_smem %s13_s26, 16, %s756_s28, [#allocation2] }
   0xc   :  { %752 = dma.done.wait [#allocation2], 16 }
   0xd   :  { %753 = vsyncadd [#allocation2], 4294967280 }
   0xe   :  { %17 = sfence }
   0xf   :  { %v51_v0 = vld [vmem:[%s1004_s1] sm:$0xff]  ;;  %v37_v1 = vld [vmem:[%s1009_s6 + $0x30] sm:$0xff]  ;;  %v757_v2 = vmov 0   ;;  %v36_v4 = vld [vmem:[%s1009_s6 + $0x28] sm:$0xff]  ;;  %v758_v5 = vmov 0.0   ;;  %vm178_vm0 = vcmask 130048  }
  0x10   :  { %714 = vset.pattern.permute.xlu0 %v757_v2  ;;  %654 = vmatprep.subr.mxu0 %v37_v1  ;;  %v39_v3 = vld [vmem:[%s1009_s6 + $0x40] sm:$0xff]  ;;  %v38_v6 = vld [vmem:[%s1009_s6 + $0x38] sm:$0xff]  ;;  %v52_v7 = vld [vmem:[%s1004_s1 + $0x8] sm:$0xff]  ;;  %vm759_vm1 = vmmov 0  }
  0x11   :  { %56 = vperm.xlu0 %714, %v51_v0   ;;  %671 = vmatprep.subr.mxu1 %v758_v5  ;;  %v35_v8 = vld [vmem:[%s1009_s6 + $0x20] sm:$0xff]  ;;  %v41_v10 = vld [vmem:[%s1009_s6 + $0x50] sm:$0xff]  ;;  %v34_v11 = vld [vmem:[%s1009_s6 + $0x18] sm:$0xff] }
  0x12   :  { %655 = vmatpush3.msra.mxu0 %v37_v1  ;;  %672 = vmatpush3.msra.mxu1 %v39_v3  ;;  %v173_v9 = vld [vmem:[%s1006_s3] sm:$0x3] }
  0x13   :  { %656 = vmatprep.subr.mxu0 %v36_v4  ;;  %673 = vmatprep.subr.mxu1 %v758_v5 }
  0x14   :  { %657 = vmatpush3.msra.mxu0 %v36_v4  ;;  %674 = vmatpush3.msra.mxu1 %v38_v6 }
  0x15   :  { %59 = vperm.xlu0 %714, %v52_v7   ;;  %675 = vmatprep.mubr.msk.f32.mxu1 %vm759_vm1, %v758_v5 }
  0x16   :  { %18 = vsyncpa [#allocation5], 0  ;;  %658 = vmatprep.subr.mxu0 %v35_v8  ;;  %676 = vmatmul.mubr.msk.f32.vlgmr.msra.gmra.mxu1 %vm178_vm0, %v173_v9  ;;  %v40_v12 = vld [vmem:[%s1009_s6 + $0x48] sm:$0xff]  ;;  %v33_v13 = vld [vmem:[%s1009_s6 + $0x10] sm:$0xff]  ;;  %v53_v22 = vlaneseq  ;;  %vm67_vm2 = vcmask 457728   ;;  %s880_s18 = sld [smem:[#allocation3 + $0x1]] }
  0x17   :  { %678 = vmatprep.subr.mxu1 %v758_v5  ;;  %659 = vmatpush3.msra.mxu0 %v35_v8  ;;  %v252_v14 = vld [vmem:[%s1007_s4] sm:$0x3]  ;;  %v32_v15 = vld [vmem:[%s1009_s6 + $0x8] sm:$0xff]  ;;  %v49_v19 = vld [vmem:[%s1009_s6 + $0x90] sm:$0xff]  ;;  %vm390_vm15 = vcmask 261120  }
  0x18   :  { %679 = vmatpush3.msra.mxu1 %v41_v10  ;;  %660 = vmatprep.subr.mxu0 %v34_v11  ;;  %v149_v16 = vld [vmem:[%s1005_s2] sm:$0xff]  ;;  %v150_v18 = vld [vmem:[%s1005_s2 + $0x8] sm:$0xff]  ;;  %v54_v23 = vand.u32 127, %v53_v22  ;;  %s878_s2 = sld [smem:[#allocation3]]  ;;  %v882_v28 = vshrl.u32 %v53_v22, 7  ;;  %v890_v31 = vld [vmem:[%s1009_s6 + $0x98] sm:$0xff] }
  0x19   :  { %680 = vmatprep.subr.mxu1 %v758_v5  ;;  %661 = vmatpush3.msra.mxu0 %v34_v11  ;;  %v31_v17 = vld [vmem:[%s1009_s6] sm:$0xff]  ;;  %v48_v20 = vld [vmem:[%s1009_s6 + $0x88] sm:$0xff]  ;;  %v46_v32 = vld [vmem:[%s1009_s6 + $0x78] sm:$0xff] }
  0x1a   :  { %681 = vmatpush3.msra.mxu1 %v40_v12  ;;  %682 = vmatprep.mubr.msk.f32.mxu1 %vm759_vm1, %v758_v5  ;;  %v47_v21 = vld [vmem:[%s1009_s6 + $0x80] sm:$0xff]  ;;  %v163_v30 = vsub.s32 2, %v882_v28  ;;  %v45_v33 = vld [vmem:[%s1009_s6 + $0x70] sm:$0xff]  ;;  %v255_v34 = vsub.s32 1, %v882_v28  ;;  %v169_v35 = vsub.s32 3, %v882_v28  ;;  %v44_v37 = vld [vmem:[%s1009_s6 + $0x68] sm:$0xff] }
  0x1b   :  { %662 = vmatprep.subr.mxu0 %v33_v13  ;;  %683 = vmatmul.mubr.msk.f32.vlgmr.msra.gmra.mxu1 %vm178_vm0, %v252_v14  ;;  %v332_v39 = vadd.s32 8, %v882_v28  ;;  %v43_v43 = vld [vmem:[%s1009_s6 + $0x60] sm:$0xff]  ;;  %v42_v53 = vld [vmem:[%s1009_s6 + $0x58] sm:$0xff]  ;;  %v176_v56 = vsub.s32 0, %v882_v28  ;;  %v387_v14 = vld [vmem:[%s1008_s5 + $0x8] sm:$0xff] }
  0x1c   :  { %663 = vmatpush3.msra.mxu0 %v33_v13  ;;  %715 = vset.pattern.permute.xlu1 %v757_v2  ;;  %p364_p6 = scmp.lt.s32.totalorder %s880_s18, 8  ;;  %v164_v36 = vrot.slane %v890_v31, %v163_v30  ;;  %s360_s25 = sadd.s32 8, %s880_s18  ;;  %v170_v44 = vrot.slane %v890_v31, %v169_v35  ;;  %v256_v45 = vrot.slane %v890_v31, %v255_v34  ;;  %v386_v12 = vld [vmem:[%s1008_s5] sm:$0xff] }
  0x1d   :  { %664 = vmatprep.subr.mxu0 %v32_v15  ;;  %153 = vperm.xlu1 %715, %v149_v16   ;;  %v361_v46 = vstv %s360_s25  ;;  %s760_s5 = smov [#allocation4]  }
  0x1e   :  { %665 = vmatpush3.msra.mxu0 %v32_v15  ;;  %685 = vmatprep.subr.mxu1 %v49_v19  ;;  %p337_p5 = scmp.lt.s32.totalorder %s878_s2, 8  ;;  %v334_v40 = vstv %s878_s2  ;;  %vm363_vm8 = vcmp.eq.s32.totalorder %v332_v39, %v361_v46  ;;  %vm362_vm11 = vcmp.eq.s32.totalorder %v882_v28, %v361_v46  ;;  %s605_s10 = sshll.u32 %s760_s5, 4  ;;  %s606_s10 = int_to_ptr.vmem [resolvable:$true] %s605_s10 }
  0x1f   :  { %666 = vmatprep.subr.mxu0 %v31_v17  ;;  %686 = vmatpush3.msra.mxu1 %v49_v19  ;;  %s900_s24 = scalar_select %p364_p6, 1, 0  ;;  %vm916_vm5 = vcmp.eq.s32.totalorder %v882_v28, %v334_v40  ;;  %vm927_vm7 = vcmp.eq.s32.totalorder %v332_v39, %v334_v40  ;;  %v555_v19 = vsub.s32 4, %v882_v28 }
  0x20   :  { %667 = vmatpush3.msra.mxu0 %v31_v17  ;;  %687 = vmatprep.subr.mxu1 %v48_v20  ;;  %s338_s1 = scalar_select %p337_p5, 1, 0 }
  0x21   :  { %158 = vperm.xlu1 %715, %v150_v18   ;;  %688 = vmatpush3.msra.mxu1 %v48_v20  ;;  %v366_v47 = vstv %s900_s24  ;;  %s732_s11 = scalar_lea.vmem %s606_s10, 256  ;;  %p737_p8 = scmp.lt.s32.totalorder %s606_s10, %s606_s10 }
  0x22   :  { %689 = vmatprep.subr.mxu1 %v47_v21  ;;  %696 = vmatprep.subr.mxu0 %v45_v33  ;;  %v339_v41 = vstv %s338_s1  ;;  %vm367_vm9 = vcmp.eq.s32.totalorder %v366_v47, 1  ;;  %p733_p7 = scmp.ne.s32.totalorder %s606_s10, %s732_s11  ;;  %p738_p9 = scmp.lt.s32.totalorder %s732_s11, %s732_s11 }
  0x23   :  { %690 = vmatpush3.msra.mxu1 %v47_v21  ;;  %vm920_vm6 = vcmp.eq.s32.totalorder %v339_v41, 1  ;;  %vm941_vm13 = vmand %vm363_vm8, %vm367_vm9  ;;  %v556_v21 = vrot.slane %v890_v31, %v555_v19 }
  0x24   :  { %691 = vmatprep.subr.mxu1 %v46_v32  ;;  %vm341_vm10 = vmand %vm916_vm5, %vm920_vm6  ;;  %p739_p10 = por %p738_p9, %p737_p8 }
  0x25   :  { %692 = vmatpush3.msra.mxu1 %v46_v32  ;;  %vm342_vm12 = vmand %vm927_vm7, %vm920_vm6 }
  0x26   :  { %vm945_vm14 = vmand %vm362_vm11, %vm367_vm9  ;;  %p740_p11 = pnand %p739_p10, %p733_p7 }
  0x8c   :  { %v57_v24 = vpop.permute.xlu0 %56 }
  0x8d   :  { %vm61_vm3 = vcmp.eq.s32.totalorder %v57_v24, %v54_v23 }
  0x8e   :  { %v616_v25 = vsel %vm61_vm3, 1.0, %v758_v5 }
  0x8f   :  { %668 = vmatprep.mubr.msk.f32.mxu0 %vm67_vm2, %v616_v25 }
  0x90   :  { %v60_v26 = vpop.permute.xlu0 %59 }
  0x91   :  { %vm62_vm4 = vcmp.eq.s32.totalorder %v60_v26, %v54_v23 }
  0x92   :  { %v617_v27 = vsel %vm62_vm4, 1.0, %v758_v5  ;;  %v177_v5 = vrot.slane %v890_v31, %v176_v56 }
  0x93   :  { %669 = vmatmul.mubr.msk.f32.vlgmr.msra.gmra.mxu0 %vm67_vm2, %v617_v27 }
  0x94   :  { %697 = vmatpush3.msra.mxu0 %v45_v33 }
  0x95   :  { %698 = vmatprep.subr.mxu0 %v44_v37 }
  0x96   :  { %699 = vmatpush3.msra.mxu0 %v44_v37 }
  0x97   :  { %700 = vmatprep.subr.mxu0 %v43_v43 }
  0x98   :  { %v154_v29 = vpop.permute.xlu1 %153  ;;  %701 = vmatpush3.msra.mxu0 %v43_v43 }
  0x99   :  { %v165_v48 = vmul.f32 %v164_v36, %v154_v29  ;;  %702 = vmatprep.subr.mxu0 %v42_v53 }
  0x9a   :  { %703 = vmatpush3.msra.mxu0 %v42_v53 }
  0x9b   :  { %v171_v57 = vadd.f32 %v170_v44, %v165_v48 }
  0x9c   :  { %v159_v38 = vpop.permute.xlu1 %158 }
  0x9d   :  { %v166_v50 = vmul.f32 %v164_v36, %v159_v38 }
  0x9f   :  { %v172_v59 = vadd.f32 %v170_v44, %v166_v50  ;;  %v594_v50 = vsub.s32 6, %v882_v28 }
  0xa1   :  { %v595_v54 = vrot.slane %v890_v31, %v594_v50 }
  0xd6   :  { %v248_v42 = vpop.f32.mrf.mxu1 }
  0xd7   :  { %v249_v6 = vadd.f32 %v248_v42, %v177_v5 }
  0xd8   :  { %v677_v49 = vpop.f32.mrf.mxu1 }
  0xd9   :  { %v350_v7 = vrot.slane %v249_v6, %v176_v56  ;;  %v377_v8 = vrot.slane %v249_v6, %v255_v34  ;;  %v588_v49 = vsub.s32 5, %v882_v28 }
  0xdb   :  { %v326_v55 = vpop.f32.mrf.mxu1  ;;  %v589_v51 = vrot.slane %v890_v31, %v588_v49 }
  0xdc   :  { %v327_v58 = vadd.f32 %v326_v55, %v256_v45 }
  0xdd   :  { %v684_v61 = vpop.f32.mrf.mxu1 }
  0xde   :  { %v356_v62 = vrot.slane %v327_v58, %v176_v56  ;;  %v383_v63 = vrot.slane %v327_v58, %v255_v34 }
  0xe0   :  { %v358_v1 = vsel %vm342_vm12, %v356_v62, %v172_v59  ;;  %v357_v2 = vsel %vm341_vm10, %v356_v62, %v171_v57 }
  0xe1   :  { %v384_v3 = vsel %vm945_vm14, %v383_v63, %v357_v2  ;;  %v385_v4 = vsel %vm941_vm13, %v383_v63, %v358_v1 }
  0xe2   :  { %693 = vmatprep.mubr.msk.f32.mxu1 %vm390_vm15, %v384_v3 }
  0xe3   :  { %694 = vmatmul.mubr.msk.f32.vlgmr.msra.gmra.mxu1 %vm390_vm15, %v385_v4 }
 0x153   :  { %v670_v9 = vpop.f32.mrf.mxu0 }
 0x154   :  { %v352_v10 = vsel %vm342_vm12, %v350_v7, %v670_v9 }
 0x155   :  { %v140_v11 = vpop.f32.mrf.mxu0  ;;  %v379_v13 = vsel %vm941_vm13, %v377_v8, %v352_v10 }
 0x156   :  { %v351_v15 = vsel %vm341_vm10, %v350_v7, %v140_v11  ;;  %v389_v18 = vadd.f32 %v387_v14, %v379_v13 }
 0x157   :  { %v378_v16 = vsel %vm945_vm14, %v377_v8, %v351_v15 }
 0x158   :  { %v388_v17 = vadd.f32 %v386_v12, %v378_v16 }
 0x15a   :  { %704 = vmatprep.mubr.msk.f32.mxu0 %vm390_vm15, %v388_v17 }
 0x15b   :  { %705 = vmatmul.mubr.msk.f32.vlgmr.msra.gmra.mxu0 %vm390_vm15, %v389_v18 }
 0x1a3   :  { %v695_v20 = vpop.f32.mrf.mxu1 }
 0x1a5   :  { %v463_v24 = vpop.f32.mrf.mxu1 }
 0x21b   :  { %v706_v22 = vpop.f32.mrf.mxu0 }
 0x21c   :  { %v550_v23 = vadd.f32 %v706_v22, %v695_v20 }
 0x21d   :  { %v544_v25 = vpop.f32.mrf.mxu0 }
 0x21e   :  { %v545_v26 = vadd.f32 %v544_v25, %v463_v24  ;;  %v558_v27 = vadd.f32 %v556_v21, %v550_v23 }
 0x220   :  { %v562_v29 = vsel %vm390_vm15, %v558_v27, 0.0  ;;  %v557_v30 = vadd.f32 %v556_v21, %v545_v26 }
 0x221   :  { %563 = vadd.xlane.f32.xlu1 %v562_v29 }
 0x222   :  { %v559_v32 = vsel %vm390_vm15, %v557_v30, 0.0 }
 0x223   :  { %560 = vadd.xlane.f32.xlu0 %v559_v32 }
 0x2aa   :  { %v564_v33 = vpop.xlane.xlu1 %563 }
 0x2ab   :  { %v567_v34 = vmul.f32 0.03125, %v564_v33 }
 0x2ac   :  { %v561_v35 = vpop.xlane.xlu0 %560 }
 0x2ad   :  { %v566_v36 = vmul.f32 0.03125, %v561_v35  ;;  %v569_v37 = vsub.f32 %v558_v27, %v567_v34 }
 0x2af   :  { %v568_v38 = vsub.f32 %v557_v30, %v566_v36  ;;  %v571_v41 = vmul.f32 %v569_v37, %v569_v37 }
 0x2b1   :  { %v570_v39 = vmul.f32 %v568_v38, %v568_v38  ;;  %v575_v42 = vsel %vm390_vm15, %v571_v41, 0.0 }
 0x2b3   :  { %v572_v40 = vsel %vm390_vm15, %v570_v39, 0.0 }
 0x2b4   :  { %573 = vadd.xlane.f32.xlu0 %v572_v40 }
 0x2b8   :  { %576 = vadd.xlane.f32.xlu0 %v575_v42 }
 0x33d   :  { %v574_v43 = vpop.xlane.xlu0 %573 }
 0x33e   :  { %v578_v44 = vmul.f32 0.03125, %v574_v43 }
 0x340   :  { %v580_v45 = vadd.f32 1e-12, %v578_v44 }
 0x341   :  { %v577_v46 = vpop.xlane.xlu0 %576 }
 0x342   :  { %716 = vrsqrt.f32 %v580_v45  ;;  %v579_v47 = vmul.f32 0.03125, %v577_v46 }
 0x344   :  { %v581_v48 = vadd.f32 1e-12, %v579_v47 }
 0x346   :  { %718 = vrsqrt.f32 %v581_v48 }
 0x34f   :  { %v717_v52 = vpop.eup %716 }
 0x350   :  { %v584_v53 = vmul.f32 %v717_v52, %v568_v38 }
 0x352   :  { %v590_v55 = vmul.f32 %v589_v51, %v584_v53 }
 0x353   :  { %v719_v56 = vpop.eup %718 }
 0x354   :  { %v585_v57 = vmul.f32 %v719_v56, %v569_v37  ;;  %v596_v58 = vadd.f32 %v595_v54, %v590_v55 }
 0x356   :  { %v591_v59 = vmul.f32 %v589_v51, %v585_v57  ;;  %598 = vst.msk [vmem:[#allocation4] sm:$0xff] %vm390_vm15, %v596_v58 }
 0x358   :  { %v597_v60 = vadd.f32 %v595_v54, %v591_v59 }
 0x35a   :  { %599 = vst.msk [vmem:[#allocation4 + $0x8] sm:$0xff] %vm390_vm15, %v597_v60 }
 0x35b   :  { %743 = shalt.err (!%p740_p11)
}
 0x35c   :  { %s761_s12 = smov 128   ;;  %s762_s13 = smov 8  }
 0x35d   :  { %611 = dma.vmem_to_hbm [thread:$0]  %s606_s10, 256, %s1010_s7, [#allocation5], %s761_s12, %s761_s12, %s762_s13  }
 0x35e   :  { %754 = dma.done.wait [#allocation5], 256  }
 0x35f   :  { %755 = vsyncadd [#allocation5], 4294967040 }
 0x360   :  { %615 = vsyncpa [#allocation5], 1 }

</bundles_post_ra>
